<compile_context>
chip_gen: v5e
topology: v5e:2x2
jax: 0.10.0
libtpu: 0.0.40
codegen_flags: <defaults>
</compile_context>

<pallas_src>
import jax
import jax.numpy as jnp
from jax.experimental import pallas as pl
from jax.experimental.pallas import tpu as pltpu


# --------------------------------------------------------------------------
# Kernel: one (Cout, tile_hw) output tile of  y[b] = W @ x[b] + bias
# --------------------------------------------------------------------------
def _conv1x1_kernel(x_ref, w_ref, b_ref, o_ref):
    # x_ref: (Cin, T) bf16   w_ref: (Cout, Cin) bf16   b_ref: (Cout, 1) f32
    y = jnp.dot(w_ref[...], x_ref[...], preferred_element_type=jnp.float32)
    o_ref[...] = (y + b_ref[...]).astype(o_ref.dtype)


def _pick_tile_hw(hw, bs, tile_hw):
    """Spatial (lane) tile: multiple of 128 (or full extent), >=4 grid steps."""
    if hw <= 128:
        return hw                                   # full-extent block is legal
    t = min(tile_hw, hw)
    t = max(128, (t // 128) * 128)                  # lane-dense: multiple of 128
    # Give the parallel grid >= 4 steps so both v7x cores can double-buffer.
    while t > 128 and bs * pl.cdiv(hw, t) < 4:
        t = max(128, ((t // 2) // 128) * 128)
    return t


# --------------------------------------------------------------------------
# Wrapper: NCHW 1x1 conv (matches nn.Conv2d(dim1, dim2, kernel_size=1))
# --------------------------------------------------------------------------
def conv1x1(x, weight, bias=None, *, tile_hw=2048, out_dtype=jnp.float32):
    """x: (bs, Cin, H, W); weight: (Cout, Cin, 1, 1); bias: (Cout,) or None."""
    bs, cin, h, w = x.shape
    cout = weight.shape[0]
    hw = h * w

    # Native-layout reshapes only (no transposes, no padding, no HBM copies).
    x_mat = x.reshape(bs, cin, hw).astype(jnp.bfloat16)          # (bs, Cin, HW)
    w_mat = weight.reshape(cout, cin).astype(jnp.bfloat16)       # (Cout, Cin)
    b_vec = (jnp.zeros((cout,), jnp.float32) if bias is None
             else bias.astype(jnp.float32))
    b_mat = b_vec.reshape(cout, 1)                               # (Cout, 1)

    t = _pick_tile_hw(hw, bs, tile_hw)
    grid = (bs, pl.cdiv(hw, t))

    out_itemsize = jnp.dtype(out_dtype).itemsize
    cost = pl.CostEstimate(
        flops=2 * bs * hw * cin * cout,
        transcendentals=0,
        bytes_accessed=(x_mat.size * 2 + w_mat.size * 2 + b_mat.size * 4
                        + bs * cout * hw * out_itemsize),
    )

    # Double-buffered x + out tiles + resident weight/bias, with headroom.
    vmem_needed = 2 * t * (cin * 2 + cout * out_itemsize) + cout * cin * 2 + cout * 4
    compiler_params = pltpu.CompilerParams(
        dimension_semantics=("parallel", "parallel"),
        vmem_limit_bytes=min(64 << 20, max(4 * vmem_needed, 16 << 20)),
    )

    y = pl.pallas_call(
        _conv1x1_kernel,
        out_shape=jax.ShapeDtypeStruct((bs, cout, hw), out_dtype),
        grid=grid,
        in_specs=[
            # x: squeezed batch dim, Cin on sublanes, spatial tile on lanes.
            pl.BlockSpec((None, cin, t), lambda b, j: (b, 0, j)),
            # weight / bias: constant block index -> VMEM-resident all grid.
            pl.BlockSpec((cout, cin), lambda b, j: (0, 0)),
            pl.BlockSpec((cout, 1), lambda b, j: (0, 0)),
        ],
        out_specs=pl.BlockSpec((None, cout, t), lambda b, j: (b, 0, j)),
        compiler_params=compiler_params,
        cost_estimate=cost,
    )(x_mat, w_mat, b_mat)

    return y.reshape(bs, cout, h, w)


if __name__ == "__main__":
    key = jax.random.PRNGKey(0)
    k_x, k_w, k_b = jax.random.split(key, 3)

    bs, cin, cout, hh, ww = 2, 4, 32, 16, 16
    x = jax.random.normal(k_x, (bs, cin, hh, ww), jnp.float32)

    # nn.Conv2d default init: U(-1/sqrt(fan_in), 1/sqrt(fan_in)), fan_in = cin
    bound = 1.0 / (cin ** 0.5)
    weight = jax.random.uniform(k_w, (cout, cin, 1, 1), jnp.float32, -bound, bound)
    bias = jax.random.uniform(k_b, (cout,), jnp.float32, -bound, bound)

    out = conv1x1(x, weight, bias)
    out = jax.block_until_ready(out)
    assert out.shape == (bs, cout, hh, ww)

    # Reference on the same bf16-rounded operands (kernel feeds MXU bf16,
    # accumulates in f32) for a tight numerical check, plus a loose f32 check.
    x_bf = x.astype(jnp.bfloat16).astype(jnp.float32)
    w_bf = weight.reshape(cout, cin).astype(jnp.bfloat16).astype(jnp.float32)
    ref_bf = jnp.einsum('bchw,oc->bohw', x_bf.reshape(bs, cin, hh, ww), w_bf) \
        + bias[None, :, None, None]
    ref_f32 = jnp.einsum('bchw,oc->bohw', x, weight.reshape(cout, cin)) \
        + bias[None, :, None, None]

    assert bool(jnp.all(jnp.isfinite(out)))
    assert bool(jnp.allclose(out, ref_bf, rtol=1e-4, atol=1e-4))
    assert bool(jnp.allclose(out, ref_f32, rtol=5e-2, atol=5e-2))

    print("KERNEL_OK")
</pallas_src>

<mosaic_0001>
module attributes {stable_mosaic.version = 11 : i64} {
  func.func @_conv1x1_kernel(%arg0: i32, %arg1: i32, %arg2: memref<1x4x128xbf16, #tpu.memory_space<vmem>>, %arg3: memref<32x4xbf16, #tpu.memory_space<vmem>>, %arg4: memref<32x1xf32, #tpu.memory_space<vmem>>, %arg5: memref<1x32x128xf32, #tpu.memory_space<vmem>>) attributes {dimension_semantics = [#tpu.dimension_semantics<parallel>, #tpu.dimension_semantics<parallel>], iteration_bounds = array<i64: 2, 2>, scalar_prefetch = 0 : i64, scratch_operands = 0 : i64, tpu.core_type = #tpu.core_type<tc>, window_params = [{transform_indices = @transform_0, window_bounds = array<i64: 1, 4, 128>}, {pipeline_mode = #tpu.pipeline_mode<synchronous>, transform_indices = @transform_1, window_bounds = array<i64: 32, 4>}, {pipeline_mode = #tpu.pipeline_mode<synchronous>, transform_indices = @transform_2, window_bounds = array<i64: 32, 1>}, {transform_indices = @transform_3, window_bounds = array<i64: 1, 32, 128>}]} {
    %c0 = arith.constant 0 : index
    %c0_0 = arith.constant 0 : index
    %0 = vector.load %arg3[%c0, %c0_0] : memref<32x4xbf16, #tpu.memory_space<vmem>>, vector<32x4xbf16>
    %c0_1 = arith.constant 0 : index
    %c0_2 = arith.constant 0 : index
    %c0_3 = arith.constant 0 : index
    %1 = vector.load %arg2[%c0_1, %c0_2, %c0_3] : memref<1x4x128xbf16, #tpu.memory_space<vmem>>, vector<1x4x128xbf16>
    %2 = vector.shape_cast %1 : vector<1x4x128xbf16> to vector<4x128xbf16>
    %cst = arith.constant dense<0.000000e+00> : vector<32x128xf32>
    %3 = tpu.matmul %0, %2, %cst {dimension_numbers = #tpu.dot_dimension_numbers<[1], [0], [0], [1], [0, 0, 1, 1], [], []>} : vector<32x4xbf16>, vector<4x128xbf16>, vector<32x128xf32> -> vector<32x128xf32>
    %c0_4 = arith.constant 0 : index
    %c0_5 = arith.constant 0 : index
    %4 = vector.load %arg4[%c0_4, %c0_5] : memref<32x1xf32, #tpu.memory_space<vmem>>, vector<32x1xf32>
    %5 = vector.broadcast %4 : vector<32x1xf32> to vector<32x128xf32>
    %6 = arith.addf %3, %5 : vector<32x128xf32>
    %c0_6 = arith.constant 0 : index
    %c0_7 = arith.constant 0 : index
    %c0_8 = arith.constant 0 : index
    %7 = vector.load %arg5[%c0_6, %c0_7, %c0_8] : memref<1x32x128xf32, #tpu.memory_space<vmem>>, vector<1x32x128xf32>
    %8 = vector.shape_cast %7 : vector<1x32x128xf32> to vector<32x128xf32>
    %9 = vector.shape_cast %6 : vector<32x128xf32> to vector<1x32x128xf32>
    tpu.vector_store %arg5[%c0_6, %c0_7, %c0_8], %9 {strides = array<i32>} : memref<1x32x128xf32, #tpu.memory_space<vmem>>, vector<1x32x128xf32>,
    return
  }
  func.func @transform_0(%arg0: i32, %arg1: i32) -> (i32, i32, i32) {
    %c0_i32 = arith.constant 0 : i32
    %c0_i32_0 = arith.constant 0 : i32
    return %arg0, %c0_i32, %arg1 : i32, i32, i32
  }
  func.func @transform_1(%arg0: i32, %arg1: i32) -> (i32, i32) {
    %c0_i32 = arith.constant 0 : i32
    %c0_i32_0 = arith.constant 0 : i32
    %c0_i32_1 = arith.constant 0 : i32
    return %c0_i32, %c0_i32_0 : i32, i32
  }
  func.func @transform_2(%arg0: i32, %arg1: i32) -> (i32, i32) {
    %c0_i32 = arith.constant 0 : i32
    %c0_i32_0 = arith.constant 0 : i32
    %c0_i32_1 = arith.constant 0 : i32
    return %c0_i32, %c0_i32_0 : i32, i32
  }
  func.func @transform_3(%arg0: i32, %arg1: i32) -> (i32, i32, i32) {
    %c0_i32 = arith.constant 0 : i32
    %c0_i32_0 = arith.constant 0 : i32
    return %arg0, %c0_i32, %arg1 : i32, i32, i32
  }
}

</mosaic_0001>

<bundles_post_ra>
// kernel: tpu_custom_call.1
= control target key start
LH: loop header
LB: loop body
LE: loop exit
PB: predicated region body
PF: predicated region fallthrough
CT: control target
= control target key end

     0   :  { %8 = vsyncpa [#allocation3], 0  ;;  %s729_s0 = inlined_call_operand.vmem [shape: bf16[2,4,256], index: 0, kind: input, shape index: {}]   ;;  %s730_s1 = inlined_call_operand.vmem [shape: bf16[32,4], index: 1, kind: input, shape index: {}]   ;;  %s731_s2 = inlined_call_operand.vmem [shape: f32[32,1], index: 2, kind: input, shape index: {}]   ;;  %s732_s3 = inlined_call_operand.hbm [shape: f32[2,32,256], index: 3, kind: output, shape index: {}]  }
   0x1   :  { %10 = vsyncpa [#allocation3 + $0x1], 0  ;;  %s589_s12 = smov 0   ;;  %s591_s13 = smov 0  }
   0x2   :  { %s593_s14 = smov 0   ;;  %s595_s15 = smov 0  }
   0x3   :  { %s597_s16 = smov 0   ;;  %s599_s17 = smov 0  }
   0x4   :  { %s601_s18 = smov 0   ;;  %s603_s19 = smov 0  }
   0x5 LB: > { %s366_s20 = sadd.s32 4294967295, %s563_s19   ;;  %s367_s21 = sadd.s32 4294967294, %s563_s19   ;;  %s563_s19 = sphi %s603_s19, %s16_s19   ;;  %s559_s18 = sphi %s601_s18, %s741_s18   ;;  %s555_s17 = sphi %s599_s17, %s740_s17   ;;  %s551_s16 = sphi %s597_s16, %s739_s16   ;;  %s547_s15 = sphi %s595_s15, %s738_s15   ;;  %s543_s14 = sphi %s593_s14, %s737_s14   ;;  %s539_s13 = sphi %s591_s13, %s736_s13   ;;  %s535_s12 = sphi %s589_s12, %s735_s12  }
   0x6   : > { %s25_s22 = sadd.s32 1, %s555_s17  ;;  %s28_s23 = sadd.s32 1, %s559_s18 }
   0x7   : > { %p26_p0 = scmp.ge.s32.totalorder %s25_s22, 2  ;;  %p117_p1 = scmp.ne.s32.totalorder %s543_s14, %s539_s13 }
   0x8   : > { %p118_p2 = scmp.eq.s32.totalorder %s366_s20, 3  ;;  %p123_p5 = scmp.ne.s32.totalorder %s539_s13, %s535_s12 }
   0x9   : > { %s743_s22 = smov (%p26_p0, %s25_s22), 0  ;;  %s745_s23 = smov (!%p26_p0, %s28_s23), %s559_s18 }
   0xa   : > { %s103_s24 = ssub.s32 %s555_s17, %s743_s22  ;;  %p640_p3 = por %p118_p2, %p117_p1 }
   0xb   : > { %p30_p4 = scmp.ge.s32.totalorder %s745_s23, 2  ;;  %p124_p6 = scmp.eq.s32.totalorder %s367_s21, 3 }
   0xc   : > { %p370_p7 = scmp.ge.s32.totalorder %s563_s19, 1  ;;  %p159_p9 = scmp.lt.s32.totalorder %s563_s19, 5 }
   0xd   : > { %s747_s23 = smov (%p30_p4, %s745_s23), 0  ;;  %p649_p8 = por %p124_p6, %p123_p5 }
   0xe   : > { %s102_s27 = ssub.s32 %s559_s18, %s747_s23  ;;  %s107_s28 = sadd.s32 1, %s543_s14 }
   0xf   : > { %s104_s29 = sor.u32 %s103_s24, %s102_s27  ;;  %p160_p10 = pnand %p370_p7, %p159_p9 }
  0x10   : > { %p105_p11 = scmp.eq.s32.totalorder %s104_s29, 0  ;;  %p186_p12 = scmp.lt.s32.totalorder (!%p160_p10), %s551_s16, 1 }
  0x11   : > { %163 = sbr.rel (%p160_p10) target bundleno = 175 (0xaf), region = 32  ;;  %p188_p13 = scmp.lt.s32.totalorder (!%p160_p10), %s547_s15, 1 }
  0x12   : > { %s658_s30 = scalar_select %p105_p11, %s543_s14, %s107_s28  }
  0x16   : > { %v202_v0 = vld [vmem:[%s731_s2 + $0x10] sm:$0xff]  ;;  %v200_v1 = vld [vmem:[%s731_s2] sm:$0xff]  ;;  %s187_s8 = scalar_select %p186_p12, %s551_s16, 1  ;;  %v565_v2 = vmov 0   ;;  %vm241_vm0 = vcmask 1041408   ;;  %v203_v4 = vld [vmem:[%s731_s2 + $0x18] sm:$0xff] }
  0x17   : > { %468 = vset.pattern.permute.xlu1 %v565_v2  ;;  %467 = vset.pattern.permute.xlu0 %v565_v2  ;;  %s189_s9 = scalar_select %p188_p13, %s547_s15, 1  ;;  %v201_v5 = vld [vmem:[%s731_s2 + $0x8] sm:$0xff]  ;;  %v389_v7 = vld [vmem:[%s730_s1] sm:$0xff]  ;;  %vm234_vm1 = vcmask 31744  }
  0x18   : > { %216 = vperm.xlu1 %468, %v202_v0   ;;  %206 = vperm.xlu0 %467, %v200_v1   ;;  %s372_s10 = sshll.u32 %s187_s8, 1  ;;  %v390_v8 = vld [vmem:[%s730_s1 + $0x8] sm:$0xff] }
  0x19   : > { %s191_s11 = sadd.s32 %s372_s10, %s189_s9  ;;  %s183_s10 = sand.u32 1, %s539_s13  }
  0x1a   : > { %s373_s20 = sshll.u32 %s191_s11, 1  ;;  %s385_s11 = sshll.u32 %s551_s16, 3 }
  0x1b   : > { %s193_s27 = scalar_lea.vmem %s729_s0, %s373_s20  ;;  %s371_s20 = sshll.u32 %s183_s10, 5 }
  0x1c   : > { %v199_v3 = vld [vmem:[%s193_s27] sm:$0x3]  ;;  %s279_s21 = sadd.s32 %s547_s15, %s385_s11  ;;  %s185_s27 = scalar_lea.vmem [#allocation2], %s371_s20 }
  0x1d   : > { %v243_v6 = vsel %vm241_vm0, %v199_v3, 0  ;;  %s386_s24 = sshll.u32 %s279_s21, 3  ;;  %s282_s5 = sshll.u32 %s185_s27, 4  ;;  %s283_s5 = int_to_ptr.vmem [resolvable:$true] %s282_s5 }
  0x1e   : > { %252 = vmatpush.bf16.msra.mxu0 %v243_v6  ;;  %391 = vmatpush.bf16.msra.mxu1 %v243_v6  ;;  %s281_s4 = scalar_lea.hbm %s732_s3, %s386_s24  ;;  %s269_s15 = scalar_lea.sflag [#allocation3], %s183_s10 }
  0x1f   : > { %s284_s6 = sshll.u32 %s281_s4, 4  ;;  %s489_s11 = scalar_lea.hbm %s732_s3, 128  ;;  %s285_s6 = int_to_ptr.hbm [resolvable:$true] %s284_s6 }
  0x20   : > { %221 = vperm.xlu1 %468, %v203_v4   ;;  %211 = vperm.xlu0 %467, %v201_v5   ;;  %s483_s16 = sshra.s32 %s285_s6, 4  ;;  %s484_s16 = int_to_ptr.hbm [resolvable:$true] %s483_s16 }
  0x21   : > { %382 = vmatmul.msk.bf16.vlgmr.msra.gmra.mxu0 %vm234_vm1, %v389_v7  ;;  %383 = vmatmul.msk.bf16.vlgmr.msra.gmra.mxu1 %vm234_vm1, %v390_v8  ;;  %s485_s7 = scalar_lea.hbm %s484_s16, 32  ;;  %p490_p4 = scmp.lt.s32.totalorder %s484_s16, %s732_s3 }
  0x22   : > { %p486_p0 = scmp.ne.s32.totalorder %s484_s16, %s485_s7  ;;  %p491_p5 = scmp.lt.s32.totalorder %s489_s11, %s485_s7 }
  0x24   : > { %p487_p1 = pnand %p486_p0, %p640_p3  ;;  %p492_p6 = por %p491_p5, %p490_p4 }
  0x26   : > { %p488_p2 = pneg %p487_p1 }
  0x28   : > { %p493_p7 = pnand %p492_p6, %p488_p2 }
  0x8a   : > { %v217_v9 = vpop.permute.xlu1 %216  ;;  %v207_v10 = vpop.permute.xlu0 %206 }
  0x92   : > { %v222_v15 = vpop.permute.xlu1 %221  ;;  %v212_v16 = vpop.permute.xlu0 %211 }
  0x9e   : > { %v254_v11 = vpop.f32.mrf.mxu0  ;;  %v259_v12 = vpop.f32.mrf.mxu1 }
  0x9f   : > { %v255_v13 = vadd.f32 %v254_v11, %v207_v10  ;;  %v260_v14 = vadd.f32 %v259_v12, %v217_v9 }
  0xa1   : > { %264 = vst [vmem:[%s185_s27] sm:$0xff] %v255_v13 }
  0xa2   : > { %266 = vst [vmem:[%s185_s27 + $0x10] sm:$0xff] %v260_v14 }
  0xa6   : > { %v256_v17 = vpop.f32.mrf.mxu0  ;;  %v261_v18 = vpop.f32.mrf.mxu1 }
  0xa7   : > { %v257_v19 = vadd.f32 %v256_v17, %v212_v16  ;;  %v262_v20 = vadd.f32 %v261_v18, %v222_v15 }
  0xa9   : > { %265 = vst [vmem:[%s185_s27 + $0x8] sm:$0xff] %v257_v19 }
  0xaa   : > { %267 = vst [vmem:[%s185_s27 + $0x18] sm:$0xff] %v262_v20 }
  0xab   : > { %496 = shalt.err (!%p493_p7)
}
  0xac   : > { %s566_s10 = smov 128   ;;  %s567_s24 = smov 256  }
  0xad   : > { %s568_s27 = smov 8  }
  0xae   : > { %392 = dma.vmem_to_hbm [thread:$0]  (%p640_p3), %s283_s5, 512, %s285_s6, %s269_s15, %s566_s10, %s567_s24, %s568_s27  }
  0xaf PF: > { %p398_p9 = scmp.ge.s32.totalorder %s563_s19, 2  ;;  %s299_s28 = sand.u32 1, %s535_s12  }
  0xb0   : > { %s300_s29 = scalar_lea.sflag [#allocation3], %s299_s28 }
  0xb1   : > { %p395_p10 = pnand %p398_p9, %p649_p8 }
  0xb3   : > { %p396_p11 = pneg %p395_p10 }
  0xb5   : > { %530 = dma.done.wait (%p396_p11), %s300_s29, 512  }
  0xb6   : > { %532 = vsyncadd (%p396_p11), %s300_s29, 4294966784  ;;  %s16_s19 = sadd.s32 1, %s563_s19   ;;  %s735_s12 = smov %s539_s13 }
  0xb7   : > { %p13_p12 = scmp.ge.s32.totalorder %s16_s19, 6   ;;  %s736_s13 = smov %s543_s14 }
  0xb8   : > { %s737_s14 = smov %s658_s30  ;;  %s738_s15 = smov %s555_s17 }
  0xb9   : > { %s739_s16 = smov %s559_s18  ;;  %s740_s17 = smov %s743_s22 }
  0xba   : > { %s741_s18 = smov %s747_s23  ;;  %15 = sbr.rel (!%p13_p12) target bundleno = 5 (0x5), region = 67 }
  0xbf   :  { %306 = vsyncpa [#allocation3], 1 }
  0xc0   :  { %308 = vsyncpa [#allocation3 + $0x1], 1 }

</bundles_post_ra>
